<compile_context>
chip_gen: v7x
topology: tpu7x:2x2x1
jax: 0.10.0
libtpu: 0.0.40
codegen_flags: <defaults>
</compile_context>

<pallas_src>
import jax
import jax.numpy as jnp
from jax.experimental import pallas as pl
from jax.experimental.pallas import tpu as pltpu


def _round_up(x, m):
    return (x + m - 1) // m * m


def _patch_embed_kernel(x_ref, w_ref, b_ref, o_ref):
    # x_ref: (tm, Kp)  w_ref: (Kp, tn)  b_ref: (1, tn) f32  o_ref: (tm, tn)
    acc = jnp.dot(x_ref[...], w_ref[...], preferred_element_type=jnp.float32)
    o_ref[...] = (acc + b_ref[...]).astype(o_ref.dtype)  # f32 epilogue


def patch_embed_matmul(patches, weight, bias, *, out_dtype=jnp.float32,
                       tm_max=512):
    """patches: (M, K); weight: (K, E); bias: (E,) f32 -> (M, E) out_dtype."""
    M, K = patches.shape
    K2, E = weight.shape
    assert K2 == K
    xb = jnp.dtype(patches.dtype).itemsize
    wb = jnp.dtype(weight.dtype).itemsize
    ob = jnp.dtype(out_dtype).itemsize

    # ---- pad everything to MXU / vreg friendly multiples -------------------
    Kp = _round_up(K, 128)                       # full MXU contraction passes
    tm = min(tm_max, _round_up(M, 128))          # 128-aligned row tile (v5e)
    Mp = _round_up(M, tm)
    Ep = _round_up(E, 128)                       # lane-dense output stores
    # Tile E only if the resident (Kp, tn) weight panel is big; otherwise keep
    # the whole weight in VMEM (fetched once, block index never changes).
    tn = Ep
    while Kp * tn * wb > (4 << 20) and tn % 256 == 0:
        tn //= 2

    if (Mp, Kp) != (M, K):
        patches = jnp.pad(patches, ((0, Mp - M), (0, Kp - K)))
    if (Kp, Ep) != (K, E):
        weight = jnp.pad(weight, ((0, Kp - K), (0, Ep - E)))
    bias2d = jnp.pad(bias.astype(jnp.float32), (0, Ep - E)).reshape(1, Ep)

    grid = (Mp // tm, Ep // tn)

    # Double-buffered VMEM working set; budget explicitly (v7x has 64 MiB
    # physical VMEM and a 32 MiB scoped default).
    vmem_est = 2 * (tm * Kp * xb + Kp * tn * wb + tn * 4 + tm * tn * ob)
    vmem_limit = int(min(max(4 * vmem_est, 32 << 20), 48 << 20))

    cost = pl.CostEstimate(
        flops=2 * Mp * Kp * Ep,
        transcendentals=0,
        bytes_accessed=Mp * Kp * xb + Kp * Ep * wb + Ep * 4 + Mp * Ep * ob,
    )

    out = pl.pallas_call(
        _patch_embed_kernel,
        out_shape=jax.ShapeDtypeStruct((Mp, Ep), out_dtype),
        grid_spec=pltpu.PrefetchScalarGridSpec(
            num_scalar_prefetch=0,
            grid=grid,
            in_specs=[
                pl.BlockSpec((tm, Kp), lambda i, j: (i, 0)),   # activations
                pl.BlockSpec((Kp, tn), lambda i, j: (0, j)),   # weight panel
                pl.BlockSpec((1, tn), lambda i, j: (0, j)),    # bias (f32)
            ],
            out_specs=pl.BlockSpec((tm, tn), lambda i, j: (i, j)),
        ),
        compiler_params=pltpu.CompilerParams(
            dimension_semantics=("parallel", "parallel"),
            vmem_limit_bytes=vmem_limit,
        ),
        cost_estimate=cost,
    )(patches, weight, bias2d)

    if (Mp, Ep) != (M, E):
        out = out[:M, :E]
    return out


class VideoPatchEmbed:
    """JAX/Pallas re-implementation of the PyTorch VideoPatchEmbed module."""

    def __init__(self, img_size=16, patch_size=4, in_chans=3, embed_dim=32,
                 num_frames=2, ln_pre=False, compute_dtype=jnp.bfloat16,
                 key=None):
        self.img_size = (img_size, img_size)
        self.patch_size = (patch_size, patch_size)
        self.num_frames = num_frames
        self.embed_dim = embed_dim
        self.in_chans = in_chans
        self.num_patches = (img_size // patch_size) ** 2 * num_frames
        self.use_bias = not ln_pre
        self.compute_dtype = compute_dtype  # bf16 MXU inputs, f32 accumulate

        if key is None:
            key = jax.random.PRNGKey(0)
        kw, kb = jax.random.split(key)
        ph, pw = self.patch_size
        fan_in = in_chans * ph * pw
        bound = 1.0 / jnp.sqrt(fan_in)
        # Conv2d weight (E, C, ph, pw), deterministic synthetic init.
        self.proj_weight = jax.random.uniform(
            kw, (embed_dim, in_chans, ph, pw), jnp.float32, -bound, bound)
        if self.use_bias:
            self.proj_bias = jax.random.uniform(
                kb, (embed_dim,), jnp.float32, -bound, bound)
        else:
            self.proj_bias = jnp.zeros((embed_dim,), jnp.float32)

    def __call__(self, x, compute_dtype=None):
        # x: (B, F, C, H, W) float32
        if compute_dtype is None:
            compute_dtype = self.compute_dtype
        B, F, C, H, W = x.shape
        assert F <= self.num_frames
        ph, pw = self.patch_size
        assert H % ph == 0 and W % pw == 0
        hp, wp = H // ph, W // pw
        E = self.embed_dim
        K = C * ph * pw

        # Patch extraction: one fused XLA transpose (under jit), materialised
        # directly in compute_dtype (bf16 by default) so the extra HBM
        # round-trip of the (M, K) patch matrix is halved.
        # TODO(synk): fold this rearrangement into the Pallas kernel itself
        # (block x over (bf, hp) row bands) to remove the HBM round-trip
        # entirely; needs a Mosaic-safe in-VMEM (C,ph,wp,pw)->(wp,K) relayout.
        xf = x.reshape(B * F, C, hp, ph, wp, pw)
        xf = jnp.transpose(xf, (0, 2, 4, 1, 3, 5))        # (BF,hp,wp,C,ph,pw)
        patches = xf.reshape(B * F * hp * wp, K).astype(compute_dtype)

        w2d = self.proj_weight.reshape(E, K).T.astype(compute_dtype)  # (K, E)

        out = patch_embed_matmul(patches, w2d, self.proj_bias,
                                 out_dtype=x.dtype)        # (M, E)
        out = out.reshape(B * F, hp * wp, E)
        return out, F, wp


if __name__ == "__main__":
    key = jax.random.PRNGKey(0)
    kx, kp = jax.random.split(key)

    B, F, C, H, W = 2, 2, 3, 16, 16
    module = VideoPatchEmbed(img_size=16, patch_size=4, in_chans=C,
                             embed_dim=32, num_frames=2, ln_pre=False, key=kp)

    x = jax.random.normal(kx, (B, F, C, H, W), dtype=jnp.float32)

    fwd = jax.jit(module.__call__, static_argnames=("compute_dtype",))

    # Exact f32 path.
    out_f32, f_out, w_out = fwd(x, compute_dtype=jnp.float32)
    # Default bf16-input / f32-accumulate path (memory-optimized).
    out_bf16, _, _ = fwd(x)
    out_f32, out_bf16 = jax.block_until_ready((out_f32, out_bf16))

    # Reference in plain JAX (same patch extraction + einsum), f32.
    ph, pw = module.patch_size
    hp, wp = H // ph, W // pw
    xf = x.reshape(B * F, C, hp, ph, wp, pw)
    xf = jnp.transpose(xf, (0, 2, 4, 1, 3, 5)).reshape(B * F, hp * wp, C * ph * pw)
    w2d = module.proj_weight.reshape(module.embed_dim, C * ph * pw)
    ref = jnp.einsum("npk,ek->npe", xf, w2d) + module.proj_bias

    assert out_f32.shape == (B * F, hp * wp, module.embed_dim)
    assert out_bf16.shape == out_f32.shape
    assert bool(f_out == F) and bool(w_out == wp)
    assert jnp.allclose(out_f32, ref, atol=1e-5, rtol=1e-5)
    assert jnp.allclose(out_bf16, ref, atol=3e-2, rtol=3e-2)

    print("KERNEL_OK")
</pallas_src>

<mosaic_0001>
module attributes {stable_mosaic.version = 11 : i64} {
  func.func @_patch_embed_kernel(%arg0: i32, %arg1: i32, %arg2: memref<128x128xf32, #tpu.memory_space<vmem>>, %arg3: memref<128x128xf32, #tpu.memory_space<vmem>>, %arg4: memref<1x128xf32, #tpu.memory_space<vmem>>, %arg5: memref<128x128xf32, #tpu.memory_space<vmem>>) attributes {dimension_semantics = [#tpu.dimension_semantics<parallel>, #tpu.dimension_semantics<parallel>], iteration_bounds = array<i64: 1, 1>, scalar_prefetch = 0 : i64, scratch_operands = 0 : i64, tpu.core_type = #tpu.core_type<tc>, window_params = [{transform_indices = @transform_0, window_bounds = array<i64: 128, 128>}, {transform_indices = @transform_1, window_bounds = array<i64: 128, 128>}, {transform_indices = @transform_2, window_bounds = array<i64: 1, 128>}, {transform_indices = @transform_3, window_bounds = array<i64: 128, 128>}]} {
    %c0 = arith.constant 0 : index
    %c0_0 = arith.constant 0 : index
    %0 = vector.load %arg2[%c0, %c0_0] : memref<128x128xf32, #tpu.memory_space<vmem>>, vector<128x128xf32>
    %c0_1 = arith.constant 0 : index
    %c0_2 = arith.constant 0 : index
    %1 = vector.load %arg3[%c0_1, %c0_2] : memref<128x128xf32, #tpu.memory_space<vmem>>, vector<128x128xf32>
    %cst = arith.constant dense<0.000000e+00> : vector<128x128xf32>
    %2 = tpu.matmul %0, %1, %cst {dimension_numbers = #tpu.dot_dimension_numbers<[1], [0], [0], [1], [0, 0, 1, 1], [], []>} : vector<128x128xf32>, vector<128x128xf32>, vector<128x128xf32> -> vector<128x128xf32>
    %c0_3 = arith.constant 0 : index
    %c0_4 = arith.constant 0 : index
    %3 = vector.load %arg4[%c0_3, %c0_4] : memref<1x128xf32, #tpu.memory_space<vmem>>, vector<1x128xf32>
    %4 = vector.broadcast %3 : vector<1x128xf32> to vector<128x128xf32>
    %5 = arith.addf %2, %4 : vector<128x128xf32>
    %c0_5 = arith.constant 0 : index
    %c0_6 = arith.constant 0 : index
    %6 = vector.load %arg5[%c0_5, %c0_6] : memref<128x128xf32, #tpu.memory_space<vmem>>, vector<128x128xf32>
    tpu.vector_store %arg5[%c0_5, %c0_6], %5 {strides = array<i32>} : memref<128x128xf32, #tpu.memory_space<vmem>>, vector<128x128xf32>,
    return
  }
  func.func @transform_0(%arg0: i32, %arg1: i32) -> (i32, i32) {
    %c0_i32 = arith.constant 0 : i32
    %c0_i32_0 = arith.constant 0 : i32
    return %arg0, %c0_i32 : i32, i32
  }
  func.func @transform_1(%arg0: i32, %arg1: i32) -> (i32, i32) {
    %c0_i32 = arith.constant 0 : i32
    %c0_i32_0 = arith.constant 0 : i32
    return %c0_i32, %arg1 : i32, i32
  }
  func.func @transform_2(%arg0: i32, %arg1: i32) -> (i32, i32) {
    %c0_i32 = arith.constant 0 : i32
    %c0_i32_0 = arith.constant 0 : i32
    return %c0_i32, %arg1 : i32, i32
  }
  func.func @transform_3(%arg0: i32, %arg1: i32) -> (i32, i32) {
    %c0_i32 = arith.constant 0 : i32
    return %arg0, %arg1 : i32, i32
  }
}

</mosaic_0001>

<bundles_post_ra>
// kernel: a_call__.1
= control target key start
LH: loop header
LB: loop body
LE: loop exit
PB: predicated region body
PF: predicated region fallthrough
CT: control target
= control target key end

     0   :  { %s522_s1 = inlined_call_operand.vmem [shape: f32[128,128], index: 1, kind: input, shape index: {}]   ;;  %s523_s0 = inlined_call_operand.vmem [shape: f32[128,128], index: 0, kind: input, shape index: {}]   ;;  %s524_s2 = inlined_call_operand.vmem [shape: f32[1,128], index: 2, kind: input, shape index: {}]   ;;  %s525_s3 = inlined_call_operand.vmem [shape: f32[128,128], index: 3, kind: output, shape index: {}]  }
   0x1   :  { %v30_v0 = vld [vmem:[%s522_s1] sm:$0xff]  ;;  %v31_v1 = vld [vmem:[%s522_s1 + $0x8] sm:$0xff]  ;;  %v32_v2 = vld [vmem:[%s522_s1 + $0x10] sm:$0xff] }
   0x2   :  { %v307_v3 = vpack.c.bf16 %v31_v1, %v30_v0  ;;  %v33_v4 = vld [vmem:[%s522_s1 + $0x18] sm:$0xff]  ;;  %v34_v6 = vld [vmem:[%s522_s1 + $0x20] sm:$0xff]  ;;  %v35_v7 = vld [vmem:[%s522_s1 + $0x28] sm:$0xff] }
   0x3   :  { %v311_v5 = vpack.c.bf16 %v33_v4, %v32_v2  ;;  %v315_v8 = vpack.c.bf16 %v35_v7, %v34_v6  ;;  %v14_v9 = vld [vmem:[%s523_s0] sm:$0xff]  ;;  %v36_v11 = vld [vmem:[%s522_s1 + $0x30] sm:$0xff]  ;;  %v37_v12 = vld [vmem:[%s522_s1 + $0x38] sm:$0xff] }
   0x4   :  { %308 = vmatprep.subr.bf16.mxu0 %v307_v3  ;;  %339 = vmatprep.subr.bf16.mxu1 %v307_v3  ;;  %v22_v10 = vld [vmem:[%s523_s0 + $0x40] sm:$0xff]  ;;  %v319_v13 = vpack.c.bf16 %v37_v12, %v36_v11  ;;  %v39_v15 = vld [vmem:[%s522_s1 + $0x48] sm:$0xff]  ;;  %v40_v17 = vld [vmem:[%s522_s1 + $0x50] sm:$0xff] }
   0x5   :  { %310 = vmatpush3.bf16.msra.mxu0 %v307_v3  ;;  %347 = vmatpush3.bf16.msra.mxu1 %v307_v3  ;;  %v38_v14 = vld [vmem:[%s522_s1 + $0x40] sm:$0xff]  ;;  %v41_v18 = vld [vmem:[%s522_s1 + $0x58] sm:$0xff]  ;;  %v43_v21 = vld [vmem:[%s522_s1 + $0x68] sm:$0xff] }
   0x6   :  { %312 = vmatprep.subr.bf16.mxu0 %v311_v5  ;;  %340 = vmatprep.subr.bf16.mxu1 %v311_v5  ;;  %v323_v16 = vpack.c.bf16 %v39_v15, %v38_v14  ;;  %v327_v19 = vpack.c.bf16 %v41_v18, %v40_v17  ;;  %v42_v20 = vld [vmem:[%s522_s1 + $0x60] sm:$0xff]  ;;  %v44_v23 = vld [vmem:[%s522_s1 + $0x70] sm:$0xff]  ;;  %v45_v24 = vld [vmem:[%s522_s1 + $0x78] sm:$0xff] }
   0x7   :  { %283 = vmatprep.mubr.f32.mxu0 %v14_v9  ;;  %295 = vmatprep.mubr.f32.mxu1 %v22_v10  ;;  %v331_v22 = vpack.c.bf16 %v43_v21, %v42_v20  ;;  %v335_v25 = vpack.c.bf16 %v45_v24, %v44_v23  ;;  %v15_v26 = vld [vmem:[%s523_s0 + $0x8] sm:$0xff]  ;;  %v16_v28 = vld [vmem:[%s523_s0 + $0x10] sm:$0xff]  ;;  %v17_v30 = vld [vmem:[%s523_s0 + $0x18] sm:$0xff] }
   0x8   :  { %v23_v27 = vld [vmem:[%s523_s0 + $0x48] sm:$0xff]  ;;  %v24_v29 = vld [vmem:[%s523_s0 + $0x50] sm:$0xff]  ;;  %v25_v31 = vld [vmem:[%s523_s0 + $0x58] sm:$0xff] }
   0x9   :  { %314 = vmatpush3.bf16.msra.mxu0 %v311_v5  ;;  %348 = vmatpush3.bf16.msra.mxu1 %v311_v5  ;;  %v18_v32 = vld [vmem:[%s523_s0 + $0x20] sm:$0xff]  ;;  %v19_v34 = vld [vmem:[%s523_s0 + $0x28] sm:$0xff]  ;;  %v20_v36 = vld [vmem:[%s523_s0 + $0x30] sm:$0xff] }
   0xa   :  { %316 = vmatprep.subr.bf16.mxu0 %v315_v8  ;;  %341 = vmatprep.subr.bf16.mxu1 %v315_v8  ;;  %v26_v33 = vld [vmem:[%s523_s0 + $0x60] sm:$0xff]  ;;  %v27_v35 = vld [vmem:[%s523_s0 + $0x68] sm:$0xff]  ;;  %v28_v37 = vld [vmem:[%s523_s0 + $0x70] sm:$0xff] }
   0xb   :  { %v21_v38 = vld [vmem:[%s523_s0 + $0x38] sm:$0xff]  ;;  %v218_v40 = vld [vmem:[%s524_s2] ss:$0 sm:$0xff] }
   0xc   :  { %v29_v39 = vld [vmem:[%s523_s0 + $0x78] sm:$0xff] }
   0xd   :  { %318 = vmatpush3.bf16.msra.mxu0 %v315_v8  ;;  %349 = vmatpush3.bf16.msra.mxu1 %v315_v8 }
   0xe   :  { %320 = vmatprep.subr.bf16.mxu0 %v319_v13  ;;  %342 = vmatprep.subr.bf16.mxu1 %v319_v13 }
  0x11   :  { %322 = vmatpush3.bf16.msra.mxu0 %v319_v13  ;;  %350 = vmatpush3.bf16.msra.mxu1 %v319_v13 }
  0x12   :  { %324 = vmatprep.subr.bf16.mxu0 %v323_v16  ;;  %343 = vmatprep.subr.bf16.mxu1 %v323_v16 }
  0x15   :  { %326 = vmatpush3.bf16.msra.mxu0 %v323_v16  ;;  %351 = vmatpush3.bf16.msra.mxu1 %v323_v16 }
  0x16   :  { %328 = vmatprep.subr.bf16.mxu0 %v327_v19  ;;  %344 = vmatprep.subr.bf16.mxu1 %v327_v19 }
  0x19   :  { %330 = vmatpush3.bf16.msra.mxu0 %v327_v19  ;;  %352 = vmatpush3.bf16.msra.mxu1 %v327_v19 }
  0x1a   :  { %332 = vmatprep.subr.bf16.mxu0 %v331_v22  ;;  %345 = vmatprep.subr.bf16.mxu1 %v331_v22 }
  0x1d   :  { %334 = vmatpush3.bf16.msra.mxu0 %v331_v22  ;;  %353 = vmatpush3.bf16.msra.mxu1 %v331_v22 }
  0x1e   :  { %336 = vmatprep.subr.bf16.mxu0 %v335_v25  ;;  %346 = vmatprep.subr.bf16.mxu1 %v335_v25 }
  0x21   :  { %338 = vmatpush3.bf16.msra.mxu0 %v335_v25  ;;  %354 = vmatpush3.bf16.msra.mxu1 %v335_v25 }
  0x24   :  { %284 = vmatmul.mubr.f32.vlgmr.msra.gmra.mrb[0].mxu0 %v15_v26  ;;  %296 = vmatmul.mubr.f32.vlgmr.msra.gmra.mrb[0].mxu1 %v23_v27 }
  0x25   :  { %286 = vmatprep.mubr.f32.mxu0 %v16_v28  ;;  %298 = vmatprep.mubr.f32.mxu1 %v24_v29 }
  0x28   :  { %287 = vmatmul.mubr.f32.gmra.mrb[2].mxu0 %v17_v30  ;;  %299 = vmatmul.mubr.f32.gmra.mrb[2].mxu1 %v25_v31 }
  0x29   :  { %289 = vmatprep.mubr.f32.mxu0 %v18_v32  ;;  %301 = vmatprep.mubr.f32.mxu1 %v26_v33 }
  0x2c   :  { %290 = vmatmul.mubr.f32.gmra.mrb[4].mxu0 %v19_v34  ;;  %302 = vmatmul.mubr.f32.gmra.mrb[4].mxu1 %v27_v35 }
  0x2d   :  { %292 = vmatprep.mubr.f32.mxu0 %v20_v36  ;;  %304 = vmatprep.mubr.f32.mxu1 %v28_v37 }
  0x30   :  { %293 = vmatmul.mubr.f32.gmra.mrb[6].mxu0 %v21_v38  ;;  %305 = vmatmul.mubr.f32.gmra.mrb[6].mxu1 %v29_v39 }
  0xf7   :  { %v285_v41 = vpop.f32.mrb[0].mxu0  ;;  %v297_v42 = vpop.f32.mrb[0].mxu1 }
  0xf8   :  { %v125_v43 = vadd.f32 %v285_v41, %v218_v40  ;;  %v165_v44 = vadd.f32 %v297_v42, %v218_v40  ;;  %v119_v45 = vpop.f32.mrb[1].mxu0  ;;  %v159_v46 = vpop.f32.mrb[1].mxu1 }
  0xf9   :  { %v120_v47 = vadd.f32 %v218_v40, %v119_v45  ;;  %v160_v48 = vadd.f32 %v218_v40, %v159_v46 }
  0xfa   :  { %199 = vst [vmem:[%s525_s3 + $0x8] sm:$0xff] %v125_v43  ;;  %207 = vst [vmem:[%s525_s3 + $0x48] sm:$0xff] %v165_v44 }
  0xfb   :  { %198 = vst [vmem:[%s525_s3] sm:$0xff] %v120_v47  ;;  %206 = vst [vmem:[%s525_s3 + $0x40] sm:$0xff] %v160_v48  ;;  %v288_v49 = vpop.f32.mrb[2].mxu0  ;;  %v300_v50 = vpop.f32.mrb[2].mxu1 }
  0xfc   :  { %v135_v51 = vadd.f32 %v288_v49, %v218_v40  ;;  %v175_v52 = vadd.f32 %v300_v50, %v218_v40  ;;  %v129_v53 = vpop.f32.mrb[3].mxu0  ;;  %v169_v54 = vpop.f32.mrb[3].mxu1 }
  0xfd   :  { %v130_v55 = vadd.f32 %v218_v40, %v129_v53  ;;  %v170_v56 = vadd.f32 %v218_v40, %v169_v54 }
  0xfe   :  { %201 = vst [vmem:[%s525_s3 + $0x18] sm:$0xff] %v135_v51  ;;  %209 = vst [vmem:[%s525_s3 + $0x58] sm:$0xff] %v175_v52 }
  0xff   :  { %200 = vst [vmem:[%s525_s3 + $0x10] sm:$0xff] %v130_v55  ;;  %208 = vst [vmem:[%s525_s3 + $0x50] sm:$0xff] %v170_v56  ;;  %v291_v57 = vpop.f32.mrb[4].mxu0  ;;  %v303_v58 = vpop.f32.mrb[4].mxu1 }
 0x100   :  { %v145_v59 = vadd.f32 %v291_v57, %v218_v40  ;;  %v185_v60 = vadd.f32 %v303_v58, %v218_v40  ;;  %v139_v61 = vpop.f32.mrb[5].mxu0  ;;  %v179_v62 = vpop.f32.mrb[5].mxu1 }
 0x101   :  { %v140_v63 = vadd.f32 %v218_v40, %v139_v61  ;;  %v180_v0 = vadd.f32 %v218_v40, %v179_v62 }
 0x102   :  { %203 = vst [vmem:[%s525_s3 + $0x28] sm:$0xff] %v145_v59  ;;  %211 = vst [vmem:[%s525_s3 + $0x68] sm:$0xff] %v185_v60 }
 0x103   :  { %202 = vst [vmem:[%s525_s3 + $0x20] sm:$0xff] %v140_v63  ;;  %210 = vst [vmem:[%s525_s3 + $0x60] sm:$0xff] %v180_v0  ;;  %v294_v1 = vpop.f32.mrb[6].mxu0  ;;  %v306_v2 = vpop.f32.mrb[6].mxu1 }
 0x104   :  { %v155_v3 = vadd.f32 %v294_v1, %v218_v40  ;;  %v195_v4 = vadd.f32 %v306_v2, %v218_v40  ;;  %v149_v5 = vpop.f32.mrb[7].mxu0  ;;  %v189_v6 = vpop.f32.mrb[7].mxu1 }
 0x105   :  { %v150_v7 = vadd.f32 %v218_v40, %v149_v5  ;;  %v190_v8 = vadd.f32 %v218_v40, %v189_v6 }
 0x106   :  { %205 = vst [vmem:[%s525_s3 + $0x38] sm:$0xff] %v155_v3  ;;  %213 = vst [vmem:[%s525_s3 + $0x78] sm:$0xff] %v195_v4 }
 0x107   :  { %204 = vst [vmem:[%s525_s3 + $0x30] sm:$0xff] %v150_v7  ;;  %212 = vst [vmem:[%s525_s3 + $0x70] sm:$0xff] %v190_v8 }

</bundles_post_ra>
